<compile_context>
chip_gen: v5e
topology: v5e:2x2
jax: 0.10.0
libtpu: 0.0.40
codegen_flags: <defaults>
</compile_context>

<pallas_src>
import math
import functools

import jax
import jax.numpy as jnp
from jax import lax
from jax.experimental import pallas as pl
from jax.experimental.pallas import tpu as pltpu

INV_SQRT2 = 1.0 / math.sqrt(2.0)
SQRT_2_OVER_PI = math.sqrt(2.0 / math.pi)
LN_EPS = 1e-12
LANE = 128


def _round_up(x, m):
    return ((x + m - 1) // m) * m


def _gelu(x, approx):
    if approx:
        # tanh-approximate GeLU: tanh runs on the (otherwise idle) EUP slot
        # instead of a long VALU erf polynomial.  Slightly different numerics.
        return 0.5 * x * (1.0 + jnp.tanh(SQRT_2_OVER_PI *
                                         (x + 0.044715 * (x * x * x))))
    # exact erf-based GeLU, matching the PyTorch reference `gelu`
    return x * 0.5 * (1.0 + lax.erf(x * INV_SQRT2))


def _mlp_kernel(*refs, agg_mul, approx_gelu):
    """agg -> (dropout=id) -> Linear -> GeLU -> BertLayerNorm -> Linear."""
    if agg_mul:
        (txt_ref, img_ref, w1_ref, b1_ref, g_ref, beta_ref,
         w2_ref, b2_ref, out_ref) = refs
        x = txt_ref[...] * img_ref[...]               # elementwise, feat dtype
        h = jnp.dot(x, w1_ref[...], preferred_element_type=jnp.float32)
    else:
        # 'cat' path: split matmul instead of a VMEM concatenate.
        (txt_ref, img_ref, w1t_ref, w1i_ref, b1_ref, g_ref, beta_ref,
         w2_ref, b2_ref, out_ref) = refs
        h = (jnp.dot(txt_ref[...], w1t_ref[...],
                     preferred_element_type=jnp.float32)
             + jnp.dot(img_ref[...], w1i_ref[...],
                       preferred_element_type=jnp.float32))
    # TODO(synk): nn.Dropout(p=0.1) modeled in eval mode (identity).
    h = h + b1_ref[...]                               # f32
    h = _gelu(h, approx_gelu)                         # f32

    # One-pass LayerNorm statistics in f32 (sum + sum-of-squares -> half the
    # cross-lane XLU reductions).  Accuracy note: E[x^2]-E[x]^2 in f32 is
    # fine at these activation scales; max(.,0) guards the sign.
    hid = h.shape[-1]
    s1 = jnp.sum(h, axis=-1, keepdims=True)
    s2 = jnp.sum(h * h, axis=-1, keepdims=True)
    mu = s1 * (1.0 / hid)
    var = jnp.maximum(s2 * (1.0 / hid) - mu * mu, 0.0)
    h = (h - mu) * lax.rsqrt(var + LN_EPS)
    h = h * g_ref[...] + beta_ref[...]

    h = h.astype(w2_ref.dtype)    # activation cast only (weights pre-cast)
    out_ref[...] = (jnp.dot(h, w2_ref[...], preferred_element_type=jnp.float32)
                    + b2_ref[...])


def _linear_kernel(*refs, agg_mul):
    """agg -> (dropout=id) -> Linear."""
    if agg_mul:
        txt_ref, img_ref, w_ref, b_ref, out_ref = refs
        x = txt_ref[...] * img_ref[...]
        out = jnp.dot(x, w_ref[...], preferred_element_type=jnp.float32)
    else:
        txt_ref, img_ref, wt_ref, wi_ref, b_ref, out_ref = refs
        out = (jnp.dot(txt_ref[...], wt_ref[...],
                       preferred_element_type=jnp.float32)
               + jnp.dot(img_ref[...], wi_ref[...],
                         preferred_element_type=jnp.float32))
    out_ref[...] = out + b_ref[...]


def xvnli_forward_pallas(text_features, image_feature, params, *,
                         agg_method="mul", classifier="mlp",
                         matmul_dtype=jnp.bfloat16, approx_gelu=False,
                         block_b=1024):
    """Pallas implementation of XVNLIXMLCLIP.forward given CLIP features."""
    B, D = text_features.shape
    agg_mul = (agg_method == "mul")
    matmul_dtype = jax.dtypes.canonicalize_dtype(matmul_dtype)
    f32 = jnp.float32

    # Features DMA'd in the matmul dtype (bf16 default: halves feature HBM
    # traffic and feeds the bf16 MXU; no per-tile casts of invariant data).
    text_features = text_features.astype(matmul_dtype)
    image_feature = image_feature.astype(matmul_dtype)

    # ---- batch tiling (dtype-aware sublane granularity, balanced tiles) ----
    gran = {4: 8, 2: 16}.get(matmul_dtype.itemsize, 32)
    # Balanced tiles (padding waste < gran rows per tile) and >= 2 grid steps
    # when the batch allows, so "parallel" shards across both v7x TensorCores.
    n_tiles = max(pl.cdiv(B, block_b), 2 if B > gran else 1)
    TB = _round_up(pl.cdiv(B, n_tiles), gran)
    Bp = _round_up(B, TB)
    if Bp != B:
        pad = Bp - B
        text_features = jnp.pad(text_features, ((0, pad), (0, 0)))
        image_feature = jnp.pad(image_feature, ((0, pad), (0, 0)))
    grid = (Bp // TB,)

    # ---- lane-dense, pre-cast parameters (weights cast ONCE here) ----
    if classifier == "mlp":
        w1, b1, gamma, beta, w2, b2 = params
        out_dim = w2.shape[1]
        out_pad = _round_up(out_dim, LANE)
        w2p = jnp.pad(w2, ((0, 0), (0, out_pad - out_dim))).astype(matmul_dtype)
        b2p = jnp.pad(b2, ((0, out_pad - out_dim),)).reshape(1, -1).astype(f32)
        b1r = b1.reshape(1, -1).astype(f32)
        gr = gamma.reshape(1, -1).astype(f32)
        betar = beta.reshape(1, -1).astype(f32)
        if agg_mul:
            param_args = (w1.astype(matmul_dtype), b1r, gr, betar, w2p, b2p)
        else:
            # split the first weight so the kernel never concatenates
            param_args = (w1[:D, :].astype(matmul_dtype),
                          w1[D:, :].astype(matmul_dtype),
                          b1r, gr, betar, w2p, b2p)
        kernel = functools.partial(_mlp_kernel, agg_mul=agg_mul,
                                   approx_gelu=approx_gelu)
    else:
        w, b = params
        out_dim = w.shape[1]
        out_pad = _round_up(out_dim, LANE)
        wp = jnp.pad(w, ((0, 0), (0, out_pad - out_dim))).astype(matmul_dtype)
        bp = jnp.pad(b, ((0, out_pad - out_dim),)).reshape(1, -1).astype(f32)
        if agg_mul:
            param_args = (wp, bp)
        else:
            param_args = (wp[:D, :], wp[D:, :], bp)
        kernel = functools.partial(_linear_kernel, agg_mul=agg_mul)

    feat_spec = pl.BlockSpec((TB, D), lambda i: (i, 0))        # batch-tiled
    out_spec = pl.BlockSpec((TB, out_pad), lambda i: (i, 0))   # lane-dense

    # VMEM budget: double-buffered feature/output tiles + resident params,
    # with headroom; clamped to [32 MiB, 64 MiB] so it is valid on v7x
    # (64 MiB physical per TC) and above the 32 MiB scoped default elsewhere.
    feat_bytes = 2 * 2 * TB * D * text_features.dtype.itemsize
    out_bytes = 2 * TB * out_pad * 4
    param_bytes = sum(int(p.size) * p.dtype.itemsize for p in param_args)
    need = int(1.5 * (feat_bytes + out_bytes + param_bytes)) + (4 << 20)
    vmem_limit = int(min(max(need, 32 << 20), 64 << 20))

    def _call(param_pipeline_mode):
        if param_pipeline_mode is None:
            param_specs = [pl.BlockSpec(p.shape, lambda i: (0, 0))
                           for p in param_args]
        else:
            # Grid-invariant params: single-buffered (frees VMEM headroom).
            param_specs = [pl.BlockSpec(p.shape, lambda i: (0, 0),
                                        pipeline_mode=param_pipeline_mode)
                           for p in param_args]
        return pl.pallas_call(
            kernel,
            grid=grid,
            in_specs=[feat_spec, feat_spec] + param_specs,
            out_specs=out_spec,
            out_shape=jax.ShapeDtypeStruct((Bp, out_pad), f32),
            compiler_params=pltpu.CompilerParams(
                dimension_semantics=("parallel",),   # megacore on v7x
                vmem_limit_bytes=vmem_limit),
        )(text_features, image_feature, *param_args)

    try:
        out_padded = _call(pl.Buffered(1))
    except Exception:
        # Fallback for jax versions where BlockSpec pipeline_mode is rejected.
        out_padded = _call(None)

    return out_padded[:B, :out_dim]


# ---------------------------------------------------------------------------
# pure-JAX reference (same math as the PyTorch module, eval mode)
# ---------------------------------------------------------------------------
def _reference(text_features, image_feature, params, *, agg_method, classifier,
               matmul_dtype=jnp.float32, approx_gelu=False):
    matmul_dtype = jax.dtypes.canonicalize_dtype(matmul_dtype)
    tf = text_features.astype(matmul_dtype)
    imf = image_feature.astype(matmul_dtype)

    def mm(a, b):
        return jnp.dot(a.astype(matmul_dtype), b.astype(matmul_dtype),
                       preferred_element_type=jnp.float32)

    if agg_method == "mul":
        x = tf * imf
    else:
        x = jnp.concatenate([tf, imf], axis=1)

    if classifier == "mlp":
        w1, b1, gamma, beta, w2, b2 = params
        h = mm(x, w1) + b1
        if approx_gelu:
            h = 0.5 * h * (1.0 + jnp.tanh(SQRT_2_OVER_PI *
                                          (h + 0.044715 * h ** 3)))
        else:
            h = h * 0.5 * (1.0 + lax.erf(h * INV_SQRT2))
        mu = h.mean(-1, keepdims=True)
        var = ((h - mu) ** 2).mean(-1, keepdims=True)
        h = (h - mu) / jnp.sqrt(var + LN_EPS) * gamma + beta
        return mm(h, w2) + b2
    else:
        w, b = params
        return mm(x, w) + b


if __name__ == "__main__":
    key = jax.random.PRNGKey(0)
    B, C, H, W = 8, 3, 16, 16        # image:  NCHW, like PyTorch
    T, V = 8, 64                     # text:   [B, T] token ids
    feat_dim, hid_dim, out_dim = 32, 32, 3

    (k_img, k_txt, k_wimg, k_wtxt, k_emb,
     k_w1, k_w2, k_wl, k_w1c, k_wlc) = jax.random.split(key, 10)

    image = jax.random.normal(k_img, (B, C, H, W), jnp.float32)
    text = jax.random.randint(k_txt, (B, T), 0, V)

    # TODO(synk): real CLIP backbone (self.clipModel) replaced by a
    # deterministic linear stub (plain-JAX glue producing the features).
    w_img = jax.random.normal(k_wimg, (C * H * W, feat_dim), jnp.float32) * 0.02
    emb = jax.random.normal(k_emb, (V, feat_dim), jnp.float32) * 0.02
    w_txt = jax.random.normal(k_wtxt, (feat_dim, feat_dim), jnp.float32) * 0.02
    image_feature = image.reshape(B, -1) @ w_img            # [B, feat_dim]
    text_features = emb[text].mean(axis=1) @ w_txt          # [B, feat_dim]

    # ---- deterministic classifier params (xavier uniform, zero bias) ----
    def xavier(k, shape):
        bound = math.sqrt(6.0 / (shape[0] + shape[1]))
        return jax.random.uniform(k, shape, jnp.float32, -bound, bound)

    in_dim = feat_dim
    w1 = xavier(k_w1, (in_dim, hid_dim))
    b1 = jnp.zeros((hid_dim,), jnp.float32)
    gamma = jnp.ones((hid_dim,), jnp.float32)
    beta = jnp.zeros((hid_dim,), jnp.float32)
    w2 = xavier(k_w2, (hid_dim, out_dim))
    b2 = jnp.zeros((out_dim,), jnp.float32)
    mlp_params = (w1, b1, gamma, beta, w2, b2)

    # ---------------- mlp classifier, agg='mul', f32 exact ------------------
    out = jax.block_until_ready(
        xvnli_forward_pallas(text_features, image_feature, mlp_params,
                             agg_method="mul", classifier="mlp",
                             matmul_dtype=jnp.float32))
    ref = _reference(text_features, image_feature, mlp_params,
                     agg_method="mul", classifier="mlp",
                     matmul_dtype=jnp.float32)
    assert out.shape == (B, out_dim)
    assert jnp.allclose(out, ref, atol=1e-4, rtol=1e-4), "mlp/mul f32 mismatch"

    # ---------------- mlp classifier, agg='mul', default bf16 fast path -----
    out_bf16 = jax.block_until_ready(
        xvnli_forward_pallas(text_features, image_feature, mlp_params,
                             agg_method="mul", classifier="mlp"))
    ref_bf16 = _reference(text_features, image_feature, mlp_params,
                          agg_method="mul", classifier="mlp",
                          matmul_dtype=jnp.bfloat16)
    assert jnp.all(jnp.isfinite(out_bf16))
    assert jnp.allclose(out_bf16, ref_bf16, atol=2e-2, rtol=2e-2), \
        "mlp/mul bf16 mismatch"

    # ---------------- mlp classifier, bf16 + tanh-approx GeLU ---------------
    out_tanh = jax.block_until_ready(
        xvnli_forward_pallas(text_features, image_feature, mlp_params,
                             agg_method="mul", classifier="mlp",
                             approx_gelu=True))
    ref_tanh = _reference(text_features, image_feature, mlp_params,
                          agg_method="mul", classifier="mlp",
                          matmul_dtype=jnp.bfloat16, approx_gelu=True)
    assert jnp.allclose(out_tanh, ref_tanh, atol=2e-2, rtol=2e-2), \
        "mlp/mul approx-gelu mismatch"

    # ---------------- linear classifier, agg='mul' (default bf16) -----------
    wl = xavier(k_wl, (in_dim, out_dim))
    bl = jnp.zeros((out_dim,), jnp.float32)
    out_lin = jax.block_until_ready(
        xvnli_forward_pallas(text_features, image_feature, (wl, bl),
                             agg_method="mul", classifier="linear"))
    ref_lin = _reference(text_features, image_feature, (wl, bl),
                         agg_method="mul", classifier="linear",
                         matmul_dtype=jnp.bfloat16)
    assert jnp.allclose(out_lin, ref_lin, atol=2e-2, rtol=2e-2), \
        "linear/mul mismatch"

    # ---------------- mlp classifier, agg='cat' (split matmul), f32 ---------
    w1c = xavier(k_w1c, (2 * feat_dim, hid_dim))
    mlp_cat_params = (w1c, b1, gamma, beta, w2, b2)
    out_cat = jax.block_until_ready(
        xvnli_forward_pallas(text_features, image_feature, mlp_cat_params,
                             agg_method="cat", classifier="mlp",
                             matmul_dtype=jnp.float32))
    ref_cat = _reference(text_features, image_feature, mlp_cat_params,
                         agg_method="cat", classifier="mlp",
                         matmul_dtype=jnp.float32)
    assert jnp.allclose(out_cat, ref_cat, atol=1e-4, rtol=1e-4), \
        "mlp/cat mismatch"

    # ---------------- linear classifier, agg='cat' (default bf16) -----------
    wlc = xavier(k_wlc, (2 * feat_dim, out_dim))
    out_lc = jax.block_until_ready(
        xvnli_forward_pallas(text_features, image_feature, (wlc, bl),
                             agg_method="cat", classifier="linear"))
    ref_lc = _reference(text_features, image_feature, (wlc, bl),
                        agg_method="cat", classifier="linear",
                        matmul_dtype=jnp.bfloat16)
    assert jnp.allclose(out_lc, ref_lc, atol=2e-2, rtol=2e-2), \
        "linear/cat mismatch"

    print("KERNEL_OK")
</pallas_src>

<mosaic_0001>
module attributes {stable_mosaic.version = 11 : i64} {
  func.func @_mlp_kernel(%arg0: i32, %arg1: memref<8x32xf32, #tpu.memory_space<vmem>>, %arg2: memref<8x32xf32, #tpu.memory_space<vmem>>, %arg3: memref<32x32xf32, #tpu.memory_space<vmem>>, %arg4: memref<1x32xf32, #tpu.memory_space<vmem>>, %arg5: memref<1x32xf32, #tpu.memory_space<vmem>>, %arg6: memref<1x32xf32, #tpu.memory_space<vmem>>, %arg7: memref<32x128xf32, #tpu.memory_space<vmem>>, %arg8: memref<1x128xf32, #tpu.memory_space<vmem>>, %arg9: memref<8x128xf32, #tpu.memory_space<vmem>>) attributes {dimension_semantics = [#tpu.dimension_semantics<parallel>], iteration_bounds = array<i64: 1>, scalar_prefetch = 0 : i64, scratch_operands = 0 : i64, tpu.core_type = #tpu.core_type<tc>, window_params = [{transform_indices = @transform_0, window_bounds = array<i64: 8, 32>}, {transform_indices = @transform_1, window_bounds = array<i64: 8, 32>}, {pipeline_mode = #tpu.pipeline_mode<synchronous>, transform_indices = @transform_2, window_bounds = array<i64: 32, 32>}, {pipeline_mode = #tpu.pipeline_mode<synchronous>, transform_indices = @transform_3, window_bounds = array<i64: 1, 32>}, {pipeline_mode = #tpu.pipeline_mode<synchronous>, transform_indices = @transform_4, window_bounds = array<i64: 1, 32>}, {pipeline_mode = #tpu.pipeline_mode<synchronous>, transform_indices = @transform_5, window_bounds = array<i64: 1, 32>}, {pipeline_mode = #tpu.pipeline_mode<synchronous>, transform_indices = @transform_6, window_bounds = array<i64: 32, 128>}, {pipeline_mode = #tpu.pipeline_mode<synchronous>, transform_indices = @transform_7, window_bounds = array<i64: 1, 128>}, {transform_indices = @transform_8, window_bounds = array<i64: 8, 128>}]} {
    %c0 = arith.constant 0 : index
    %c0_0 = arith.constant 0 : index
    %0 = vector.load %arg1[%c0, %c0_0] : memref<8x32xf32, #tpu.memory_space<vmem>>, vector<8x32xf32>
    %c0_1 = arith.constant 0 : index
    %c0_2 = arith.constant 0 : index
    %1 = vector.load %arg2[%c0_1, %c0_2] : memref<8x32xf32, #tpu.memory_space<vmem>>, vector<8x32xf32>
    %2 = arith.mulf %0, %1 : vector<8x32xf32>
    %c0_3 = arith.constant 0 : index
    %c0_4 = arith.constant 0 : index
    %3 = vector.load %arg3[%c0_3, %c0_4] : memref<32x32xf32, #tpu.memory_space<vmem>>, vector<32x32xf32>
    %cst = arith.constant dense<0.000000e+00> : vector<8x32xf32>
    %4 = tpu.matmul %2, %3, %cst {dimension_numbers = #tpu.dot_dimension_numbers<[1], [0], [0], [1], [0, 0, 1, 1], [], []>} : vector<8x32xf32>, vector<32x32xf32>, vector<8x32xf32> -> vector<8x32xf32>
    %c0_5 = arith.constant 0 : index
    %c0_6 = arith.constant 0 : index
    %5 = vector.load %arg4[%c0_5, %c0_6] : memref<1x32xf32, #tpu.memory_space<vmem>>, vector<1x32xf32>
    %6 = vector.broadcast %5 : vector<1x32xf32> to vector<8x32xf32>
    %7 = arith.addf %4, %6 : vector<8x32xf32>
    %cst_7 = arith.constant 5.000000e-01 : f32
    %8 = vector.broadcast %cst_7 : f32 to vector<8x32xf32>
    %9 = arith.mulf %7, %8 : vector<8x32xf32>
    %cst_8 = arith.constant 0.707106769 : f32
    %10 = vector.broadcast %cst_8 : f32 to vector<8x32xf32>
    %11 = arith.mulf %7, %10 : vector<8x32xf32>
    %12 = math.erf %11 : vector<8x32xf32>
    %cst_9 = arith.constant 1.000000e+00 : f32
    %13 = vector.broadcast %cst_9 : f32 to vector<8x32xf32>
    %14 = arith.addf %13, %12 : vector<8x32xf32>
    %15 = arith.mulf %9, %14 : vector<8x32xf32>
    %cst_10 = arith.constant dense<0.000000e+00> : vector<8xf32>
    %16 = vector.multi_reduction <add>, %15, %cst_10 [1] : vector<8x32xf32> to vector<8xf32>
    %17 = vector.shape_cast %16 : vector<8xf32> to vector<8x1xf32>
    %18 = arith.mulf %15, %15 : vector<8x32xf32>
    %cst_11 = arith.constant dense<0.000000e+00> : vector<8xf32>
    %19 = vector.multi_reduction <add>, %18, %cst_11 [1] : vector<8x32xf32> to vector<8xf32>
    %20 = vector.shape_cast %19 : vector<8xf32> to vector<8x1xf32>
    %cst_12 = arith.constant 3.125000e-02 : f32
    %21 = vector.broadcast %cst_12 : f32 to vector<8x1xf32>
    %22 = arith.mulf %17, %21 : vector<8x1xf32>
    %cst_13 = arith.constant 3.125000e-02 : f32
    %23 = vector.broadcast %cst_13 : f32 to vector<8x1xf32>
    %24 = arith.mulf %20, %23 : vector<8x1xf32>
    %25 = arith.mulf %22, %22 : vector<8x1xf32>
    %26 = arith.subf %24, %25 : vector<8x1xf32>
    %cst_14 = arith.constant 0.000000e+00 : f32
    %27 = vector.broadcast %cst_14 : f32 to vector<8x1xf32>
    %28 = arith.maximumf %26, %27 : vector<8x1xf32>
    %29 = vector.broadcast %22 : vector<8x1xf32> to vector<8x32xf32>
    %30 = arith.subf %15, %29 : vector<8x32xf32>
    %cst_15 = arith.constant 9.99999996E-13 : f32
    %31 = vector.broadcast %cst_15 : f32 to vector<8x1xf32>
    %32 = arith.addf %28, %31 : vector<8x1xf32>
    %33 = math.rsqrt %32 : vector<8x1xf32>
    %34 = vector.broadcast %33 : vector<8x1xf32> to vector<8x32xf32>
    %35 = arith.mulf %30, %34 : vector<8x32xf32>
    %c0_16 = arith.constant 0 : index
    %c0_17 = arith.constant 0 : index
    %36 = vector.load %arg5[%c0_16, %c0_17] : memref<1x32xf32, #tpu.memory_space<vmem>>, vector<1x32xf32>
    %37 = vector.broadcast %36 : vector<1x32xf32> to vector<8x32xf32>
    %38 = arith.mulf %35, %37 : vector<8x32xf32>
    %c0_18 = arith.constant 0 : index
    %c0_19 = arith.constant 0 : index
    %39 = vector.load %arg6[%c0_18, %c0_19] : memref<1x32xf32, #tpu.memory_space<vmem>>, vector<1x32xf32>
    %40 = vector.broadcast %39 : vector<1x32xf32> to vector<8x32xf32>
    %41 = arith.addf %38, %40 : vector<8x32xf32>
    %c0_20 = arith.constant 0 : index
    %c0_21 = arith.constant 0 : index
    %42 = vector.load %arg7[%c0_20, %c0_21] : memref<32x128xf32, #tpu.memory_space<vmem>>, vector<32x128xf32>
    %cst_22 = arith.constant dense<0.000000e+00> : vector<8x128xf32>
    %43 = tpu.matmul %41, %42, %cst_22 {dimension_numbers = #tpu.dot_dimension_numbers<[1], [0], [0], [1], [0, 0, 1, 1], [], []>} : vector<8x32xf32>, vector<32x128xf32>, vector<8x128xf32> -> vector<8x128xf32>
    %c0_23 = arith.constant 0 : index
    %c0_24 = arith.constant 0 : index
    %44 = vector.load %arg8[%c0_23, %c0_24] : memref<1x128xf32, #tpu.memory_space<vmem>>, vector<1x128xf32>
    %45 = vector.broadcast %44 : vector<1x128xf32> to vector<8x128xf32>
    %46 = arith.addf %43, %45 : vector<8x128xf32>
    %c0_25 = arith.constant 0 : index
    %c0_26 = arith.constant 0 : index
    %47 = vector.load %arg9[%c0_25, %c0_26] : memref<8x128xf32, #tpu.memory_space<vmem>>, vector<8x128xf32>
    tpu.vector_store %arg9[%c0_25, %c0_26], %46 {strides = array<i32>} : memref<8x128xf32, #tpu.memory_space<vmem>>, vector<8x128xf32>,
    return
  }
  func.func @transform_0(%arg0: i32) -> (i32, i32) {
    %c0_i32 = arith.constant 0 : i32
    %c0_i32_0 = arith.constant 0 : i32
    return %arg0, %c0_i32 : i32, i32
  }
  func.func @transform_1(%arg0: i32) -> (i32, i32) {
    %c0_i32 = arith.constant 0 : i32
    %c0_i32_0 = arith.constant 0 : i32
    return %arg0, %c0_i32 : i32, i32
  }
  func.func @transform_2(%arg0: i32) -> (i32, i32) {
    %c0_i32 = arith.constant 0 : i32
    %c0_i32_0 = arith.constant 0 : i32
    %c0_i32_1 = arith.constant 0 : i32
    return %c0_i32, %c0_i32_0 : i32, i32
  }
  func.func @transform_3(%arg0: i32) -> (i32, i32) {
    %c0_i32 = arith.constant 0 : i32
    %c0_i32_0 = arith.constant 0 : i32
    %c0_i32_1 = arith.constant 0 : i32
    return %c0_i32, %c0_i32_0 : i32, i32
  }
  func.func @transform_4(%arg0: i32) -> (i32, i32) {
    %c0_i32 = arith.constant 0 : i32
    %c0_i32_0 = arith.constant 0 : i32
    %c0_i32_1 = arith.constant 0 : i32
    return %c0_i32, %c0_i32_0 : i32, i32
  }
  func.func @transform_5(%arg0: i32) -> (i32, i32) {
    %c0_i32 = arith.constant 0 : i32
    %c0_i32_0 = arith.constant 0 : i32
    %c0_i32_1 = arith.constant 0 : i32
    return %c0_i32, %c0_i32_0 : i32, i32
  }
  func.func @transform_6(%arg0: i32) -> (i32, i32) {
    %c0_i32 = arith.constant 0 : i32
    %c0_i32_0 = arith.constant 0 : i32
    %c0_i32_1 = arith.constant 0 : i32
    return %c0_i32, %c0_i32_0 : i32, i32
  }
  func.func @transform_7(%arg0: i32) -> (i32, i32) {
    %c0_i32 = arith.constant 0 : i32
    %c0_i32_0 = arith.constant 0 : i32
    %c0_i32_1 = arith.constant 0 : i32
    return %c0_i32, %c0_i32_0 : i32, i32
  }
  func.func @transform_8(%arg0: i32) -> (i32, i32) {
    %c0_i32 = arith.constant 0 : i32
    %c0_i32_0 = arith.constant 0 : i32
    return %arg0, %c0_i32 : i32, i32
  }
}

module attributes {stable_mosaic.version = 11 : i64} {
  func.func @_mlp_kernel(%arg0: i32, %arg1: memref<8x32xf32, #tpu.memory_space<vmem>>, %arg2: memref<8x32xf32, #tpu.memory_space<vmem>>, %arg3: memref<32x32xf32, #tpu.memory_space<vmem>>, %arg4: memref<1x32xf32, #tpu.memory_space<vmem>>, %arg5: memref<1x32xf32, #tpu.memory_space<vmem>>, %arg6: memref<1x32xf32, #tpu.memory_space<vmem>>, %arg7: memref<32x128xf32, #tpu.memory_space<vmem>>, %arg8: memref<1x128xf32, #tpu.memory_space<vmem>>, %arg9: memref<8x128xf32, #tpu.memory_space<vmem>>) attributes {dimension_semantics = [#tpu.dimension_semantics<parallel>], iteration_bounds = array<i64: 1>, scalar_prefetch = 0 : i64, scratch_operands = 0 : i64, tpu.core_type = #tpu.core_type<tc>, window_params = [{transform_indices = @transform_0, window_bounds = array<i64: 8, 32>}, {transform_indices = @transform_1, window_bounds = array<i64: 8, 32>}, {pipeline_mode = #tpu.pipeline_mode<synchronous>, transform_indices = @transform_2, window_bounds = array<i64: 32, 32>}, {pipeline_mode = #tpu.pipeline_mode<synchronous>, transform_indices = @transform_3, window_bounds = array<i64: 1, 32>}, {pipeline_mode = #tpu.pipeline_mode<synchronous>, transform_indices = @transform_4, window_bounds = array<i64: 1, 32>}, {pipeline_mode = #tpu.pipeline_mode<synchronous>, transform_indices = @transform_5, window_bounds = array<i64: 1, 32>}, {pipeline_mode = #tpu.pipeline_mode<synchronous>, transform_indices = @transform_6, window_bounds = array<i64: 32, 128>}, {pipeline_mode = #tpu.pipeline_mode<synchronous>, transform_indices = @transform_7, window_bounds = array<i64: 1, 128>}, {transform_indices = @transform_8, window_bounds = array<i64: 8, 128>}]} {
    %c0 = arith.constant 0 : index
    %c0_0 = arith.constant 0 : index
    %0 = vector.load %arg1[%c0, %c0_0] : memref<8x32xf32, #tpu.memory_space<vmem>>, vector<8x32xf32>
    %c0_1 = arith.constant 0 : index
    %c0_2 = arith.constant 0 : index
    %1 = vector.load %arg2[%c0_1, %c0_2] : memref<8x32xf32, #tpu.memory_space<vmem>>, vector<8x32xf32>
    %2 = arith.mulf %0, %1 : vector<8x32xf32>
    %c0_3 = arith.constant 0 : index
    %c0_4 = arith.constant 0 : index
    %3 = vector.load %arg3[%c0_3, %c0_4] : memref<32x32xf32, #tpu.memory_space<vmem>>, vector<32x32xf32>
    %cst = arith.constant dense<0.000000e+00> : vector<8x32xf32>
    %4 = tpu.matmul %2, %3, %cst {dimension_numbers = #tpu.dot_dimension_numbers<[1], [0], [0], [1], [0, 0, 1, 1], [], []>} : vector<8x32xf32>, vector<32x32xf32>, vector<8x32xf32> -> vector<8x32xf32>
    %c0_5 = arith.constant 0 : index
    %c0_6 = arith.constant 0 : index
    %5 = vector.load %arg4[%c0_5, %c0_6] : memref<1x32xf32, #tpu.memory_space<vmem>>, vector<1x32xf32>
    %6 = vector.broadcast %5 : vector<1x32xf32> to vector<8x32xf32>
    %7 = arith.addf %4, %6 : vector<8x32xf32>
    %cst_7 = arith.constant 5.000000e-01 : f32
    %8 = vector.broadcast %cst_7 : f32 to vector<8x32xf32>
    %9 = arith.mulf %7, %8 : vector<8x32xf32>
    %cst_8 = arith.constant 0.707106769 : f32
    %10 = vector.broadcast %cst_8 : f32 to vector<8x32xf32>
    %11 = arith.mulf %7, %10 : vector<8x32xf32>
    %12 = math.erf %11 : vector<8x32xf32>
    %cst_9 = arith.constant 1.000000e+00 : f32
    %13 = vector.broadcast %cst_9 : f32 to vector<8x32xf32>
    %14 = arith.addf %13, %12 : vector<8x32xf32>
    %15 = arith.mulf %9, %14 : vector<8x32xf32>
    %cst_10 = arith.constant dense<0.000000e+00> : vector<8xf32>
    %16 = vector.multi_reduction <add>, %15, %cst_10 [1] : vector<8x32xf32> to vector<8xf32>
    %17 = vector.shape_cast %16 : vector<8xf32> to vector<8x1xf32>
    %18 = arith.mulf %15, %15 : vector<8x32xf32>
    %cst_11 = arith.constant dense<0.000000e+00> : vector<8xf32>
    %19 = vector.multi_reduction <add>, %18, %cst_11 [1] : vector<8x32xf32> to vector<8xf32>
    %20 = vector.shape_cast %19 : vector<8xf32> to vector<8x1xf32>
    %cst_12 = arith.constant 3.125000e-02 : f32
    %21 = vector.broadcast %cst_12 : f32 to vector<8x1xf32>
    %22 = arith.mulf %17, %21 : vector<8x1xf32>
    %cst_13 = arith.constant 3.125000e-02 : f32
    %23 = vector.broadcast %cst_13 : f32 to vector<8x1xf32>
    %24 = arith.mulf %20, %23 : vector<8x1xf32>
    %25 = arith.mulf %22, %22 : vector<8x1xf32>
    %26 = arith.subf %24, %25 : vector<8x1xf32>
    %cst_14 = arith.constant 0.000000e+00 : f32
    %27 = vector.broadcast %cst_14 : f32 to vector<8x1xf32>
    %28 = arith.maximumf %26, %27 : vector<8x1xf32>
    %29 = vector.broadcast %22 : vector<8x1xf32> to vector<8x32xf32>
    %30 = arith.subf %15, %29 : vector<8x32xf32>
    %cst_15 = arith.constant 9.99999996E-13 : f32
    %31 = vector.broadcast %cst_15 : f32 to vector<8x1xf32>
    %32 = arith.addf %28, %31 : vector<8x1xf32>
    %33 = math.rsqrt %32 : vector<8x1xf32>
    %34 = vector.broadcast %33 : vector<8x1xf32> to vector<8x32xf32>
    %35 = arith.mulf %30, %34 : vector<8x32xf32>
    %c0_16 = arith.constant 0 : index
    %c0_17 = arith.constant 0 : index
    %36 = vector.load %arg5[%c0_16, %c0_17] : memref<1x32xf32, #tpu.memory_space<vmem>>, vector<1x32xf32>
    %37 = vector.broadcast %36 : vector<1x32xf32> to vector<8x32xf32>
    %38 = arith.mulf %35, %37 : vector<8x32xf32>
    %c0_18 = arith.constant 0 : index
    %c0_19 = arith.constant 0 : index
    %39 = vector.load %arg6[%c0_18, %c0_19] : memref<1x32xf32, #tpu.memory_space<vmem>>, vector<1x32xf32>
    %40 = vector.broadcast %39 : vector<1x32xf32> to vector<8x32xf32>
    %41 = arith.addf %38, %40 : vector<8x32xf32>
    %c0_20 = arith.constant 0 : index
    %c0_21 = arith.constant 0 : index
    %42 = vector.load %arg7[%c0_20, %c0_21] : memref<32x128xf32, #tpu.memory_space<vmem>>, vector<32x128xf32>
    %cst_22 = arith.constant dense<0.000000e+00> : vector<8x128xf32>
    %43 = tpu.matmul %41, %42, %cst_22 {dimension_numbers = #tpu.dot_dimension_numbers<[1], [0], [0], [1], [0, 0, 1, 1], [], []>} : vector<8x32xf32>, vector<32x128xf32>, vector<8x128xf32> -> vector<8x128xf32>
    %c0_23 = arith.constant 0 : index
    %c0_24 = arith.constant 0 : index
    %44 = vector.load %arg8[%c0_23, %c0_24] : memref<1x128xf32, #tpu.memory_space<vmem>>, vector<1x128xf32>
    %45 = vector.broadcast %44 : vector<1x128xf32> to vector<8x128xf32>
    %46 = arith.addf %43, %45 : vector<8x128xf32>
    %c0_25 = arith.constant 0 : index
    %c0_26 = arith.constant 0 : index
    %47 = vector.load %arg9[%c0_25, %c0_26] : memref<8x128xf32, #tpu.memory_space<vmem>>, vector<8x128xf32>
    tpu.vector_store %arg9[%c0_25, %c0_26], %46 {strides = array<i32>} : memref<8x128xf32, #tpu.memory_space<vmem>>, vector<8x128xf32>,
    return
  }
  func.func @transform_0(%arg0: i32) -> (i32, i32) {
    %c0_i32 = arith.constant 0 : i32
    %c0_i32_0 = arith.constant 0 : i32
    return %arg0, %c0_i32 : i32, i32
  }
  func.func @transform_1(%arg0: i32) -> (i32, i32) {
    %c0_i32 = arith.constant 0 : i32
    %c0_i32_0 = arith.constant 0 : i32
    return %arg0, %c0_i32 : i32, i32
  }
  func.func @transform_2(%arg0: i32) -> (i32, i32) {
    %c0_i32 = arith.constant 0 : i32
    %c0_i32_0 = arith.constant 0 : i32
    %c0_i32_1 = arith.constant 0 : i32
    return %c0_i32, %c0_i32_0 : i32, i32
  }
  func.func @transform_3(%arg0: i32) -> (i32, i32) {
    %c0_i32 = arith.constant 0 : i32
    %c0_i32_0 = arith.constant 0 : i32
    %c0_i32_1 = arith.constant 0 : i32
    return %c0_i32, %c0_i32_0 : i32, i32
  }
  func.func @transform_4(%arg0: i32) -> (i32, i32) {
    %c0_i32 = arith.constant 0 : i32
    %c0_i32_0 = arith.constant 0 : i32
    %c0_i32_1 = arith.constant 0 : i32
    return %c0_i32, %c0_i32_0 : i32, i32
  }
  func.func @transform_5(%arg0: i32) -> (i32, i32) {
    %c0_i32 = arith.constant 0 : i32
    %c0_i32_0 = arith.constant 0 : i32
    %c0_i32_1 = arith.constant 0 : i32
    return %c0_i32, %c0_i32_0 : i32, i32
  }
  func.func @transform_6(%arg0: i32) -> (i32, i32) {
    %c0_i32 = arith.constant 0 : i32
    %c0_i32_0 = arith.constant 0 : i32
    %c0_i32_1 = arith.constant 0 : i32
    return %c0_i32, %c0_i32_0 : i32, i32
  }
  func.func @transform_7(%arg0: i32) -> (i32, i32) {
    %c0_i32 = arith.constant 0 : i32
    %c0_i32_0 = arith.constant 0 : i32
    %c0_i32_1 = arith.constant 0 : i32
    return %c0_i32, %c0_i32_0 : i32, i32
  }
  func.func @transform_8(%arg0: i32) -> (i32, i32) {
    %c0_i32 = arith.constant 0 : i32
    %c0_i32_0 = arith.constant 0 : i32
    return %arg0, %c0_i32 : i32, i32
  }
}

</mosaic_0001>

<bundles_post_ra>
// kernel: tpu_custom_call.1
= control target key start
LH: loop header
LB: loop body
LE: loop exit
PB: predicated region body
PF: predicated region fallthrough
CT: control target
= control target key end

     0   :  { %13 = vsyncpa [#allocation3], 0  ;;  %s483_s0 = inlined_call_operand.hbm [shape: f32[8,32], index: 0, kind: input, shape index: {}]   ;;  %s484_s1 = inlined_call_operand.hbm [shape: f32[8,32], index: 1, kind: input, shape index: {}]   ;;  %s485_s2 = inlined_call_operand.hbm [shape: f32[32,32], index: 2, kind: input, shape index: {}]   ;;  %s486_s3 = inlined_call_operand.vmem [shape: f32[1,32], index: 3, kind: input, shape index: {}]   ;;  %s487_s4 = inlined_call_operand.vmem [shape: f32[1,32], index: 4, kind: input, shape index: {}]   ;;  %s488_s5 = inlined_call_operand.vmem [shape: f32[1,32], index: 5, kind: input, shape index: {}]   ;;  %s489_s6 = inlined_call_operand.hbm [shape: f32[32,128], index: 6, kind: input, shape index: {}]   ;;  %s490_s7 = inlined_call_operand.vmem [shape: f32[1,128], index: 7, kind: input, shape index: {}]   ;;  %s491_s8 = inlined_call_operand.hbm [shape: f32[8,128], index: 8, kind: output, shape index: {}]  }
   0x1   :  { %14 = vsyncpa [#allocation6], 0 }
   0x2   :  { %15 = vsyncpa [#allocation9], 0  ;;  %s33_s29 = sshll.u32 %s484_s1, 4  ;;  %s34_s29 = int_to_ptr.hbm [resolvable:$true] %s33_s29 }
   0x3   :  { %16 = vsyncpa [#allocation4], 0  ;;  %s400_s30 = smov [#allocation5]   ;;  %s22_s12 = sshll.u32 %s483_s0, 4  ;;  %s23_s12 = int_to_ptr.hbm [resolvable:$true] %s22_s12 }
   0x4   :  { %s35_s9 = sshll.u32 %s400_s30, 4  ;;  %s401_s13 = smov [#allocation2]   ;;  %s36_s9 = int_to_ptr.vmem [resolvable:$true] %s35_s9 }
   0x5   :  { %38 = dma.hbm_to_vmem [thread:$0]  %s34_s29, 128, %s36_s9, [#allocation6]  }
   0x6   :  { %s24_s14 = sshll.u32 %s401_s13, 4  ;;  %s43_s17 = sshll.u32 %s485_s2, 4  ;;  %s25_s14 = int_to_ptr.vmem [resolvable:$true] %s24_s14  ;;  %s44_s17 = int_to_ptr.hbm [resolvable:$true] %s43_s17 }
   0x7   :  { %27 = dma.hbm_to_vmem [thread:$0]  %s23_s12, 128, %s25_s14, [#allocation3]  }
   0x8   :  { %s402_s1 = smov [#allocation7]   ;;  %s62_s21 = sshll.u32 %s489_s6, 4  ;;  %s63_s21 = int_to_ptr.hbm [resolvable:$true] %s62_s21 }
   0x9   :  { %s45_s18 = sshll.u32 %s402_s1, 4  ;;  %s403_s22 = smov 128   ;;  %s46_s18 = int_to_ptr.vmem [resolvable:$true] %s45_s18 }
   0xa   :  { %s404_s0 = smov 8   ;;  %s405_s23 = smov [#allocation8]  }
   0xb   :  { %51 = dma.hbm_to_vmem [thread:$0]  %s44_s17, 512, %s46_s18, [#allocation6], %s403_s22, %s403_s22, %s404_s0  }
   0xc   :  { %s64_s24 = sshll.u32 %s405_s23, 4  ;;  %s65_s24 = int_to_ptr.vmem [resolvable:$true] %s64_s24 }
   0xd   :  { %70 = dma.hbm_to_vmem [thread:$0]  %s63_s21, 512, %s65_s24, [#allocation9], %s403_s22, %s403_s22, %s404_s0  }
   0xe   :  { %392 = dma.done.wait [#allocation3], 128  }
   0xf   :  { %393 = vsyncadd [#allocation3], 4294967168 }
  0x10   :  { %394 = dma.done.wait [#allocation6], 640  }
  0x11   :  { %395 = vsyncadd [#allocation6], 4294966656 }
  0x12   :  { %396 = dma.done.wait [#allocation9], 512  }
  0x13   :  { %397 = vsyncadd [#allocation9], 4294966784  ;;  %v95_v0 = vld [vmem:[#allocation7 + $0x18] sm:$0xff]  ;;  %v94_v1 = vld [vmem:[#allocation7 + $0x10] sm:$0xff]  ;;  %vm100_vm0 = vcmask 261120   ;;  %s406_s30 = smov [#allocation10]  }
  0x14   :  { %116 = vmatpush.msra.mxu0 %v95_v0  ;;  %v89_v2 = vld [vmem:[#allocation2] sm:$0xff]  ;;  %v90_v3 = vld [vmem:[#allocation5] sm:$0xff]  ;;  %v93_v4 = vld [vmem:[#allocation7 + $0x8] sm:$0xff]  ;;  %s240_s9 = sshll.u32 %s406_s30, 4  ;;  %s241_s9 = int_to_ptr.vmem [resolvable:$true] %s240_s9 }
  0x15   :  { %v92_v5 = vld [vmem:[#allocation7] sm:$0xff]  ;;  %v91_v6 = vmul.f32 %v90_v3, %v89_v2  ;;  %v264_v7 = vld [vmem:[%s486_s3] ss:$0 sm:$0xff]  ;;  %v206_v53 = vld [vmem:[#allocation8 + $0x18] sm:$0xff] }
  0x16   :  { %117 = vmatpush.msra.mxu0 %v94_v1  ;;  %v205_v54 = vld [vmem:[#allocation8 + $0x10] sm:$0xff]  ;;  %226 = vmatpush.msra.mxu1 %v206_v53  ;;  %v204_v55 = vld [vmem:[#allocation8 + $0x8] sm:$0xff]  ;;  %v203_v56 = vld [vmem:[#allocation8] sm:$0xff] }
  0x18   :  { %118 = vmatpush.msra.mxu0 %v93_v4  ;;  %227 = vmatpush.msra.mxu1 %v205_v54 }
  0x1a   :  { %119 = vmatpush.msra.mxu0 %v92_v5  ;;  %228 = vmatpush.msra.mxu1 %v204_v55 }
  0x1b   :  { %254 = vmatmul.msk.f32.vlgmr.msra.gmra.mxu0 %vm100_vm0, %v91_v6 }
  0x1c   :  { %229 = vmatpush.msra.mxu1 %v203_v56 }
  0x98   :  { %v121_v8 = vpop.f32.mrf.mxu0 }
  0x99   :  { %v122_v9 = vadd.f32 %v264_v7, %v121_v8  ;;  %v265_v7 = vld [vmem:[%s487_s4] ss:$0 sm:$0xff]  ;;  %s242_s4 = sshll.u32 %s491_s8, 4  ;;  %s243_s4 = int_to_ptr.hbm [resolvable:$true] %s242_s4 }
  0x9b   :  { %v125_v10 = vmul.f32 0.70710677, %v122_v9  ;;  %v124_v46 = vmul.f32 0.5, %v122_v9 }
  0x9d   :  { %v126_v11 = vmul.f32 %v125_v10, %v125_v10 }
  0x9f   :  { %v127_v12 = vmin.f32 %v126_v11, 16.0 }
  0xa1   :  { %v128_v13 = vmul.f32 2.1237322e-06, %v127_v12  ;;  %v139_v14 = vmul.f32 3.8918573e-05, %v127_v12 }
  0xa3   :  { %v129_v15 = vadd.f32 0.00028619796, %v128_v13  ;;  %v140_v16 = vadd.f32 0.001143296, %v139_v14  ;;  %v267_v13 = vld [vmem:[%s490_s7] ss:$0 sm:$0xff] }
  0xa5   :  { %v130_v17 = vmul.f32 %v129_v15, %v127_v12  ;;  %v141_v18 = vmul.f32 %v140_v16, %v127_v12 }
  0xa7   :  { %v142_v19 = vadd.f32 0.014752088, %v141_v18  ;;  %v131_v20 = vadd.f32 0.0036580483, %v130_v17 }
  0xa9   :  { %v143_v21 = vmul.f32 %v142_v19, %v127_v12  ;;  %v132_v23 = vmul.f32 %v131_v20, %v127_v12 }
  0xab   :  { %v144_v22 = vadd.f32 0.112945676, %v143_v21  ;;  %v133_v26 = vadd.f32 0.05243302, %v132_v23 }
  0xad   :  { %v145_v24 = vmul.f32 %v144_v22, %v127_v12  ;;  %v134_v29 = vmul.f32 %v133_v26, %v127_v12 }
  0xaf   :  { %v146_v25 = vadd.f32 0.4994258, %v145_v24  ;;  %v135_v30 = vadd.f32 0.18741608, %v134_v29 }
  0xb1   :  { %v147_v27 = vmul.f32 %v146_v25, %v127_v12  ;;  %v136_v32 = vmul.f32 %v135_v30, %v127_v12 }
  0xb3   :  { %v148_v28 = vadd.f32 1.0, %v147_v27  ;;  %v137_v36 = vadd.f32 1.1283791, %v136_v32 }
  0xb5   :  { %268 = vrcp.f32 %v148_v28  ;;  %v160_v35 = vand.u32 2147483648, %v148_v28  ;;  %v158_v38 = vand.u32 2147483647, %v148_v28  ;;  %vm154_vm2 = vweird.f32 %v148_v28 }
  0xb6   :  { %v138_v41 = vmul.f32 %v137_v36, %v125_v10  ;;  %v266_v10 = vld [vmem:[%s488_s5] ss:$0 sm:$0xff] }
  0xb7   :  { %v161_v40 = vor.u32 1.1754944e-38, %v160_v35  ;;  %vm159_vm4 = vcmp.eq.f32.partialorder %v158_v38, 8.507059e+37 }
  0xbb   :  { %v269_v31 = vpop.eup %268 }
  0xbc   :  { %v150_v33 = vmul.f32 %v269_v31, %v148_v28  ;;  %vm155_vm1 = vweird.f32 %v269_v31 }
  0xbd   :  { %vm156_vm3 = vmor %vm154_vm2, %vm155_vm1 }
  0xbe   :  { %v151_v34 = vsub.f32 1.0, %v150_v33 }
  0xc0   :  { %v152_v37 = vmul.f32 %v269_v31, %v151_v34 }
  0xc2   :  { %v153_v39 = vadd.f32 %v269_v31, %v152_v37 }
  0xc4   :  { %v157_v42 = vsel %vm156_vm3, %v269_v31, %v153_v39 }
  0xc5   :  { %v162_v43 = vsel %vm159_vm4, %v161_v40, %v157_v42 }
  0xc6   :  { %v163_v44 = vmul.f32 %v162_v43, %v138_v41 }
  0xc8   :  { %v255_v45 = vclamps-f32 %v163_v44, 1.0 }
  0xca   :  { %v166_v47 = vadd.f32 1.0, %v255_v45 }
  0xcc   :  { %v167_v48 = vmul.f32 %v166_v47, %v124_v46 }
  0xce   :  { %v168_v49 = vsel %vm100_vm0, %v167_v48, 0.0  ;;  %v171_v50 = vmul.f32 %v167_v48, %v167_v48 }
  0xcf   :  { %169 = vadd.xlane.f32.xlu0 %v168_v49 }
  0xd0   :  { %v172_v51 = vsel %vm100_vm0, %v171_v50, 0.0 }
  0xd7   :  { %173 = vadd.xlane.f32.xlu0 %v172_v51 }
 0x142   :  { %v170_v52 = vpop.xlane.xlu0 %169 }
 0x143   :  { %v175_v57 = vmul.f32 0.03125, %v170_v52 }
 0x145   :  { %v177_v59 = vmul.f32 %v175_v57, %v175_v57  ;;  %v180_v6 = vsub.f32 %v167_v48, %v175_v57 }
 0x14a   :  { %v174_v58 = vpop.xlane.xlu0 %173 }
 0x14b   :  { %v176_v60 = vmul.f32 0.03125, %v174_v58 }
 0x14d   :  { %v178_v61 = vsub.f32 %v176_v60, %v177_v59 }
 0x14f   :  { %v179_v62 = vmax.f32 %v178_v61, 0.0 }
 0x151   :  { %v181_v63 = vadd.f32 1e-12, %v179_v62 }
 0x153   :  { %270 = vrsqrt.f32 %v181_v63  ;;  %vm188_vm6 = vweird.f32 %v181_v63 }
 0x159   :  { %v271_v0 = vpop.eup %270 }
 0x15a   :  { %v183_v1 = vmul.f32 %v271_v0, %v181_v63  ;;  %vm189_vm5 = vweird.f32 %v271_v0 }
 0x15b   :  { %vm190_vm7 = vmor %vm188_vm6, %vm189_vm5 }
 0x15c   :  { %v184_v2 = vmul.f32 %v271_v0, %v183_v1 }
 0x15e   :  { %v185_v3 = vmul.f32 0.5, %v184_v2 }
 0x160   :  { %v186_v4 = vsub.f32 1.5, %v185_v3 }
 0x162   :  { %v187_v5 = vmul.f32 %v271_v0, %v186_v4 }
 0x164   :  { %v191_v8 = vsel %vm190_vm7, %v271_v0, %v187_v5 }
 0x165   :  { %v192_v9 = vmul.f32 %v191_v8, %v180_v6 }
 0x167   :  { %v197_v11 = vmul.f32 %v265_v7, %v192_v9 }
 0x169   :  { %v202_v12 = vadd.f32 %v266_v10, %v197_v11 }
 0x16b   :  { %256 = vmatmul.msk.f32.vlgmr.msra.gmra.mxu1 %vm100_vm0, %v202_v12 }
 0x1e8   :  { %v231_v14 = vpop.f32.mrf.mxu1 }
 0x1e9   :  { %v232_v15 = vadd.f32 %v267_v13, %v231_v14 }
 0x1eb   :  { %234 = vst [vmem:[#allocation10] sm:$0xff] %v232_v15 }
 0x1ec   :  { %245 = dma.vmem_to_hbm [thread:$0]  %s241_s9, 128, %s243_s4, [#allocation4]  }
 0x1ed   :  { %398 = dma.done.wait [#allocation4], 128  }
 0x1ee   :  { %399 = vsyncadd [#allocation4], 4294967168 }
 0x1ef   :  { %250 = vsyncpa [#allocation3], 1 }
 0x1f0   :  { %251 = vsyncpa [#allocation6], 1 }
 0x1f1   :  { %252 = vsyncpa [#allocation9], 1 }
 0x1f2   :  { %253 = vsyncpa [#allocation4], 1 }

// kernel: tpu_custom_call.1
= control target key start
LH: loop header
LB: loop body
LE: loop exit
PB: predicated region body
PF: predicated region fallthrough
CT: control target
= control target key end

     0   :  { %13 = vsyncpa [#allocation3], 0  ;;  %s483_s0 = inlined_call_operand.hbm [shape: f32[8,32], index: 0, kind: input, shape index: {}]   ;;  %s484_s1 = inlined_call_operand.hbm [shape: f32[8,32], index: 1, kind: input, shape index: {}]   ;;  %s485_s2 = inlined_call_operand.hbm [shape: f32[32,32], index: 2, kind: input, shape index: {}]   ;;  %s486_s3 = inlined_call_operand.vmem [shape: f32[1,32], index: 3, kind: input, shape index: {}]   ;;  %s487_s4 = inlined_call_operand.vmem [shape: f32[1,32], index: 4, kind: input, shape index: {}]   ;;  %s488_s5 = inlined_call_operand.vmem [shape: f32[1,32], index: 5, kind: input, shape index: {}]   ;;  %s489_s6 = inlined_call_operand.hbm [shape: f32[32,128], index: 6, kind: input, shape index: {}]   ;;  %s490_s7 = inlined_call_operand.vmem [shape: f32[1,128], index: 7, kind: input, shape index: {}]   ;;  %s491_s8 = inlined_call_operand.hbm [shape: f32[8,128], index: 8, kind: output, shape index: {}]  }
   0x1   :  { %14 = vsyncpa [#allocation6], 0 }
   0x2   :  { %15 = vsyncpa [#allocation9], 0  ;;  %s33_s29 = sshll.u32 %s484_s1, 4  ;;  %s34_s29 = int_to_ptr.hbm [resolvable:$true] %s33_s29 }
   0x3   :  { %16 = vsyncpa [#allocation4], 0  ;;  %s400_s30 = smov [#allocation5]   ;;  %s22_s12 = sshll.u32 %s483_s0, 4  ;;  %s23_s12 = int_to_ptr.hbm [resolvable:$true] %s22_s12 }
   0x4   :  { %s35_s9 = sshll.u32 %s400_s30, 4  ;;  %s401_s13 = smov [#allocation2]   ;;  %s36_s9 = int_to_ptr.vmem [resolvable:$true] %s35_s9 }
   0x5   :  { %38 = dma.hbm_to_vmem [thread:$0]  %s34_s29, 128, %s36_s9, [#allocation6]  }
   0x6   :  { %s24_s14 = sshll.u32 %s401_s13, 4  ;;  %s43_s17 = sshll.u32 %s485_s2, 4  ;;  %s25_s14 = int_to_ptr.vmem [resolvable:$true] %s24_s14  ;;  %s44_s17 = int_to_ptr.hbm [resolvable:$true] %s43_s17 }
   0x7   :  { %27 = dma.hbm_to_vmem [thread:$0]  %s23_s12, 128, %s25_s14, [#allocation3]  }
   0x8   :  { %s402_s1 = smov [#allocation7]   ;;  %s62_s21 = sshll.u32 %s489_s6, 4  ;;  %s63_s21 = int_to_ptr.hbm [resolvable:$true] %s62_s21 }
   0x9   :  { %s45_s18 = sshll.u32 %s402_s1, 4  ;;  %s403_s22 = smov 128   ;;  %s46_s18 = int_to_ptr.vmem [resolvable:$true] %s45_s18 }
   0xa   :  { %s404_s0 = smov 8   ;;  %s405_s23 = smov [#allocation8]  }
   0xb   :  { %51 = dma.hbm_to_vmem [thread:$0]  %s44_s17, 512, %s46_s18, [#allocation6], %s403_s22, %s403_s22, %s404_s0  }
   0xc   :  { %s64_s24 = sshll.u32 %s405_s23, 4  ;;  %s65_s24 = int_to_ptr.vmem [resolvable:$true] %s64_s24 }
   0xd   :  { %70 = dma.hbm_to_vmem [thread:$0]  %s63_s21, 512, %s65_s24, [#allocation9], %s403_s22, %s403_s22, %s404_s0  }
   0xe   :  { %392 = dma.done.wait [#allocation3], 128  }
   0xf   :  { %393 = vsyncadd [#allocation3], 4294967168 }
  0x10   :  { %394 = dma.done.wait [#allocation6], 640  }
  0x11   :  { %395 = vsyncadd [#allocation6], 4294966656 }
  0x12   :  { %396 = dma.done.wait [#allocation9], 512  }
  0x13   :  { %397 = vsyncadd [#allocation9], 4294966784  ;;  %v95_v0 = vld [vmem:[#allocation7 + $0x18] sm:$0xff]  ;;  %v94_v1 = vld [vmem:[#allocation7 + $0x10] sm:$0xff]  ;;  %vm100_vm0 = vcmask 261120   ;;  %s406_s30 = smov [#allocation10]  }
  0x14   :  { %116 = vmatpush.msra.mxu0 %v95_v0  ;;  %v89_v2 = vld [vmem:[#allocation2] sm:$0xff]  ;;  %v90_v3 = vld [vmem:[#allocation5] sm:$0xff]  ;;  %v93_v4 = vld [vmem:[#allocation7 + $0x8] sm:$0xff]  ;;  %s240_s9 = sshll.u32 %s406_s30, 4  ;;  %s241_s9 = int_to_ptr.vmem [resolvable:$true] %s240_s9 }
  0x15   :  { %v92_v5 = vld [vmem:[#allocation7] sm:$0xff]  ;;  %v91_v6 = vmul.f32 %v90_v3, %v89_v2  ;;  %v264_v7 = vld [vmem:[%s486_s3] ss:$0 sm:$0xff]  ;;  %v206_v53 = vld [vmem:[#allocation8 + $0x18] sm:$0xff] }
  0x16   :  { %117 = vmatpush.msra.mxu0 %v94_v1  ;;  %v205_v54 = vld [vmem:[#allocation8 + $0x10] sm:$0xff]  ;;  %226 = vmatpush.msra.mxu1 %v206_v53  ;;  %v204_v55 = vld [vmem:[#allocation8 + $0x8] sm:$0xff]  ;;  %v203_v56 = vld [vmem:[#allocation8] sm:$0xff] }
  0x18   :  { %118 = vmatpush.msra.mxu0 %v93_v4  ;;  %227 = vmatpush.msra.mxu1 %v205_v54 }
  0x1a   :  { %119 = vmatpush.msra.mxu0 %v92_v5  ;;  %228 = vmatpush.msra.mxu1 %v204_v55 }
  0x1b   :  { %254 = vmatmul.msk.f32.vlgmr.msra.gmra.mxu0 %vm100_vm0, %v91_v6 }
  0x1c   :  { %229 = vmatpush.msra.mxu1 %v203_v56 }
  0x98   :  { %v121_v8 = vpop.f32.mrf.mxu0 }
  0x99   :  { %v122_v9 = vadd.f32 %v264_v7, %v121_v8  ;;  %v265_v7 = vld [vmem:[%s487_s4] ss:$0 sm:$0xff]  ;;  %s242_s4 = sshll.u32 %s491_s8, 4  ;;  %s243_s4 = int_to_ptr.hbm [resolvable:$true] %s242_s4 }
  0x9b   :  { %v125_v10 = vmul.f32 0.70710677, %v122_v9  ;;  %v124_v46 = vmul.f32 0.5, %v122_v9 }
  0x9d   :  { %v126_v11 = vmul.f32 %v125_v10, %v125_v10 }
  0x9f   :  { %v127_v12 = vmin.f32 %v126_v11, 16.0 }
  0xa1   :  { %v128_v13 = vmul.f32 2.1237322e-06, %v127_v12  ;;  %v139_v14 = vmul.f32 3.8918573e-05, %v127_v12 }
  0xa3   :  { %v129_v15 = vadd.f32 0.00028619796, %v128_v13  ;;  %v140_v16 = vadd.f32 0.001143296, %v139_v14  ;;  %v267_v13 = vld [vmem:[%s490_s7] ss:$0 sm:$0xff] }
  0xa5   :  { %v130_v17 = vmul.f32 %v129_v15, %v127_v12  ;;  %v141_v18 = vmul.f32 %v140_v16, %v127_v12 }
  0xa7   :  { %v142_v19 = vadd.f32 0.014752088, %v141_v18  ;;  %v131_v20 = vadd.f32 0.0036580483, %v130_v17 }
  0xa9   :  { %v143_v21 = vmul.f32 %v142_v19, %v127_v12  ;;  %v132_v23 = vmul.f32 %v131_v20, %v127_v12 }
  0xab   :  { %v144_v22 = vadd.f32 0.112945676, %v143_v21  ;;  %v133_v26 = vadd.f32 0.05243302, %v132_v23 }
  0xad   :  { %v145_v24 = vmul.f32 %v144_v22, %v127_v12  ;;  %v134_v29 = vmul.f32 %v133_v26, %v127_v12 }
  0xaf   :  { %v146_v25 = vadd.f32 0.4994258, %v145_v24  ;;  %v135_v30 = vadd.f32 0.18741608, %v134_v29 }
  0xb1   :  { %v147_v27 = vmul.f32 %v146_v25, %v127_v12  ;;  %v136_v32 = vmul.f32 %v135_v30, %v127_v12 }
  0xb3   :  { %v148_v28 = vadd.f32 1.0, %v147_v27  ;;  %v137_v36 = vadd.f32 1.1283791, %v136_v32 }
  0xb5   :  { %268 = vrcp.f32 %v148_v28  ;;  %v160_v35 = vand.u32 2147483648, %v148_v28  ;;  %v158_v38 = vand.u32 2147483647, %v148_v28  ;;  %vm154_vm2 = vweird.f32 %v148_v28 }
  0xb6   :  { %v138_v41 = vmul.f32 %v137_v36, %v125_v10  ;;  %v266_v10 = vld [vmem:[%s488_s5] ss:$0 sm:$0xff] }
  0xb7   :  { %v161_v40 = vor.u32 1.1754944e-38, %v160_v35  ;;  %vm159_vm4 = vcmp.eq.f32.partialorder %v158_v38, 8.507059e+37 }
  0xbb   :  { %v269_v31 = vpop.eup %268 }
  0xbc   :  { %v150_v33 = vmul.f32 %v269_v31, %v148_v28  ;;  %vm155_vm1 = vweird.f32 %v269_v31 }
  0xbd   :  { %vm156_vm3 = vmor %vm154_vm2, %vm155_vm1 }
  0xbe   :  { %v151_v34 = vsub.f32 1.0, %v150_v33 }
  0xc0   :  { %v152_v37 = vmul.f32 %v269_v31, %v151_v34 }
  0xc2   :  { %v153_v39 = vadd.f32 %v269_v31, %v152_v37 }
  0xc4   :  { %v157_v42 = vsel %vm156_vm3, %v269_v31, %v153_v39 }
  0xc5   :  { %v162_v43 = vsel %vm159_vm4, %v161_v40, %v157_v42 }
  0xc6   :  { %v163_v44 = vmul.f32 %v162_v43, %v138_v41 }
  0xc8   :  { %v255_v45 = vclamps-f32 %v163_v44, 1.0 }
  0xca   :  { %v166_v47 = vadd.f32 1.0, %v255_v45 }
  0xcc   :  { %v167_v48 = vmul.f32 %v166_v47, %v124_v46 }
  0xce   :  { %v168_v49 = vsel %vm100_vm0, %v167_v48, 0.0  ;;  %v171_v50 = vmul.f32 %v167_v48, %v167_v48 }
  0xcf   :  { %169 = vadd.xlane.f32.xlu0 %v168_v49 }
  0xd0   :  { %v172_v51 = vsel %vm100_vm0, %v171_v50, 0.0 }
  0xd7   :  { %173 = vadd.xlane.f32.xlu0 %v172_v51 }
 0x142   :  { %v170_v52 = vpop.xlane.xlu0 %169 }
 0x143   :  { %v175_v57 = vmul.f32 0.03125, %v170_v52 }
 0x145   :  { %v177_v59 = vmul.f32 %v175_v57, %v175_v57  ;;  %v180_v6 = vsub.f32 %v167_v48, %v175_v57 }
 0x14a   :  { %v174_v58 = vpop.xlane.xlu0 %173 }
 0x14b   :  { %v176_v60 = vmul.f32 0.03125, %v174_v58 }
 0x14d   :  { %v178_v61 = vsub.f32 %v176_v60, %v177_v59 }
 0x14f   :  { %v179_v62 = vmax.f32 %v178_v61, 0.0 }
 0x151   :  { %v181_v63 = vadd.f32 1e-12, %v179_v62 }
 0x153   :  { %270 = vrsqrt.f32 %v181_v63  ;;  %vm188_vm6 = vweird.f32 %v181_v63 }
 0x159   :  { %v271_v0 = vpop.eup %270 }
 0x15a   :  { %v183_v1 = vmul.f32 %v271_v0, %v181_v63  ;;  %vm189_vm5 = vweird.f32 %v271_v0 }
 0x15b   :  { %vm190_vm7 = vmor %vm188_vm6, %vm189_vm5 }
 0x15c   :  { %v184_v2 = vmul.f32 %v271_v0, %v183_v1 }
 0x15e   :  { %v185_v3 = vmul.f32 0.5, %v184_v2 }
 0x160   :  { %v186_v4 = vsub.f32 1.5, %v185_v3 }
 0x162   :  { %v187_v5 = vmul.f32 %v271_v0, %v186_v4 }
 0x164   :  { %v191_v8 = vsel %vm190_vm7, %v271_v0, %v187_v5 }
 0x165   :  { %v192_v9 = vmul.f32 %v191_v8, %v180_v6 }
 0x167   :  { %v197_v11 = vmul.f32 %v265_v7, %v192_v9 }
 0x169   :  { %v202_v12 = vadd.f32 %v266_v10, %v197_v11 }
 0x16b   :  { %256 = vmatmul.msk.f32.vlgmr.msra.gmra.mxu1 %vm100_vm0, %v202_v12 }
 0x1e8   :  { %v231_v14 = vpop.f32.mrf.mxu1 }
 0x1e9   :  { %v232_v15 = vadd.f32 %v267_v13, %v231_v14 }
 0x1eb   :  { %234 = vst [vmem:[#allocation10] sm:$0xff] %v232_v15 }
 0x1ec   :  { %245 = dma.vmem_to_hbm [thread:$0]  %s241_s9, 128, %s243_s4, [#allocation4]  }
 0x1ed   :  { %398 = dma.done.wait [#allocation4], 128  }
 0x1ee   :  { %399 = vsyncadd [#allocation4], 4294967168 }
 0x1ef   :  { %250 = vsyncpa [#allocation3], 1 }
 0x1f0   :  { %251 = vsyncpa [#allocation6], 1 }
 0x1f1   :  { %252 = vsyncpa [#allocation9], 1 }
 0x1f2   :  { %253 = vsyncpa [#allocation4], 1 }

</bundles_post_ra>
